<compile_context>
chip_gen: v7x
topology: tpu7x:2x2x1
jax: 0.10.0
libtpu: 0.0.40
codegen_flags: <defaults>
</compile_context>

<pallas_src>
import functools

import jax
import jax.numpy as jnp
from jax import lax
from jax.experimental import pallas as pl
from jax.experimental.pallas import tpu as pltpu


def _round_up(n, m):
    return ((n + m - 1) // m) * m


def _lstm_fc_kernel(x_ref, wih_ref, whh_ref, b_ref, wfc_ref, bfc_ref,
                    out_ref, *, seq_len, batch_pad, hidden_size):
    """One batch-block: full LSTM recurrence + final Linear.

    x_ref:   (T*BP, D)   time-major, batch-padded inputs for this batch block
    wih_ref: (D, 4H)     W_ih^T        whh_ref: (H, 4H)  W_hh^T
    b_ref:   (1, 4H)     b_ih + b_hh   (PyTorch gate order i, f, g, o)
    wfc_ref: (H, CP)     W_fc^T (lane-padded)   bfc_ref: (1, CP)
    out_ref: (BP, CP)    lane-dense logits slab for this batch block
    """
    T, BP, H = seq_len, batch_pad, hidden_size

    # Hoisted weight loads: live in vregs for the whole kernel.
    wih = wih_ref[...]                  # (D, 4H)
    whh = whh_ref[...]                  # (H, 4H)
    b = b_ref[...]                      # (1, 4H)

    # Input projection for ALL time steps as one MXU op, kept as a value
    # (vregs), no VMEM scratch round-trip on the serial path.
    xproj = jnp.dot(x_ref[...], wih, preferred_element_type=jnp.float32) + b

    # Lane mask selecting the "g" (cell-candidate, tanh) gate block.
    # Hoisted out of the loop (JAX does not CSE broadcast_in_dim).
    lane = lax.broadcasted_iota(jnp.int32, (BP, 4 * H), 1)
    is_g = (lane >= 2 * H) & (lane < 3 * H)

    h = jnp.zeros((BP, H), jnp.float32)
    c = jnp.zeros((BP, H), jnp.float32)

    # Fully-unrolled static time loop (T is small here); static slices into the
    # vreg-resident xproj.
    # TODO(synk): for long sequences (T*BP >> 256 rows) switch xproj back to a
    # VMEM scratch and use a partially-unrolled fori_loop / time-chunked grid.
    for t in range(T):
        gates = xproj[t * BP:(t + 1) * BP, :] + jnp.dot(
            h, whh, preferred_element_type=jnp.float32)      # (BP, 4H)
        # Full-width activations (1 EUP sigmoid + 1 EUP tanh over the tile),
        # combined via a VPU lane select; then static gate slices.
        act = jnp.where(is_g, jnp.tanh(gates), jax.nn.sigmoid(gates))
        i_g = act[:, 0 * H:1 * H]
        f_g = act[:, 1 * H:2 * H]
        g_g = act[:, 2 * H:3 * H]
        o_g = act[:, 3 * H:4 * H]
        c = f_g * c + i_g * g_g
        h = o_g * jnp.tanh(c)

    # Final linear layer on the last hidden state -> lane-dense output slab.
    logits = (jnp.dot(h, wfc_ref[...], preferred_element_type=jnp.float32)
              + bfc_ref[...])
    out_ref[...] = logits.astype(out_ref.dtype)


def rnn_forward_pallas(x, w_ih, w_hh, b_ih, b_hh, w_fc, b_fc):
    """x: [B, T, D] float32.  Returns {'out': [B, num_classes]}."""
    B, T, D = x.shape
    H = w_hh.shape[1]
    C = w_fc.shape[0]

    # Batch tile: fill MXU rows with batch (up to 128 rows / instance); any
    # remaining batch becomes a parallel grid axis (2 TCs on v7x).
    BP = min(_round_up(B, 8), 128)
    NB = pl.cdiv(B, BP)
    Bpad = NB * BP
    # Lane-dense output slab (multiple of 128); slice back to C in the wrapper.
    CP = _round_up(C, 128)

    # Glue in plain JAX: batch-pad, per-block time-major flatten, transposes.
    xp = jnp.pad(x, ((0, Bpad - B), (0, 0), (0, 0)))          # (Bpad, T, D)
    xb = jnp.transpose(xp.reshape(NB, BP, T, D), (0, 2, 1, 3))  # (NB, T, BP, D)
    x2d = xb.reshape(NB * T * BP, D)                          # (NB*T*BP, D)

    wih_t = jnp.transpose(w_ih)                               # (D, 4H)
    whh_t = jnp.transpose(w_hh)                               # (H, 4H)
    b = (b_ih + b_hh).reshape(1, 4 * H)                       # (1, 4H)
    wfc_t = jnp.pad(jnp.transpose(w_fc), ((0, 0), (0, CP - C)))  # (H, CP)
    bfc = jnp.pad(b_fc, (0, CP - C)).reshape(1, CP)           # (1, CP)

    kernel = functools.partial(_lstm_fc_kernel, seq_len=T, batch_pad=BP,
                               hidden_size=H)

    out = pl.pallas_call(
        kernel,
        out_shape=jax.ShapeDtypeStruct((Bpad, CP), x.dtype),
        grid=(NB,),
        in_specs=[
            pl.BlockSpec((T * BP, D), lambda nb: (nb, 0)),    # x (this block)
            pl.BlockSpec((D, 4 * H), lambda nb: (0, 0)),      # W_ih^T
            pl.BlockSpec((H, 4 * H), lambda nb: (0, 0)),      # W_hh^T
            pl.BlockSpec((1, 4 * H), lambda nb: (0, 0)),      # bias
            pl.BlockSpec((H, CP), lambda nb: (0, 0)),         # W_fc^T (padded)
            pl.BlockSpec((1, CP), lambda nb: (0, 0)),         # b_fc (padded)
        ],
        out_specs=pl.BlockSpec((BP, CP), lambda nb: (nb, 0)),
        compiler_params=pltpu.CompilerParams(
            dimension_semantics=("parallel",),                # batch blocks
            vmem_limit_bytes=32 * 1024 * 1024,
        ),
    )(x2d, wih_t, whh_t, b, wfc_t, bfc)
    return {"out": out[:B, :C]}


def rnn_forward_ref(x, w_ih, w_hh, b_ih, b_hh, w_fc, b_fc):
    """Pure-JAX reference matching PyTorch nn.LSTM(batch_first=True) + Linear."""
    B, T, D = x.shape
    H = w_hh.shape[1]
    wih_t, whh_t = jnp.transpose(w_ih), jnp.transpose(w_hh)
    b = b_ih + b_hh

    def step(carry, x_t):
        h, c = carry
        gates = x_t @ wih_t + h @ whh_t + b
        i_g = jax.nn.sigmoid(gates[:, 0 * H:1 * H])
        f_g = jax.nn.sigmoid(gates[:, 1 * H:2 * H])
        g_g = jnp.tanh(gates[:, 2 * H:3 * H])
        o_g = jax.nn.sigmoid(gates[:, 3 * H:4 * H])
        c = f_g * c + i_g * g_g
        h = o_g * jnp.tanh(c)
        return (h, c), None

    init = (jnp.zeros((B, H), jnp.float32), jnp.zeros((B, H), jnp.float32))
    (h_last, _), _ = jax.lax.scan(step, init, jnp.transpose(x, (1, 0, 2)))
    return h_last @ jnp.transpose(w_fc) + b_fc


if __name__ == "__main__":
    B, T, D, H, C = 2, 8, 32, 32, 8

    key = jax.random.PRNGKey(0)
    ks = jax.random.split(key, 8)
    scale = 1.0 / jnp.sqrt(H)   # matches PyTorch's U(-1/sqrt(H), 1/sqrt(H))

    x = jax.random.normal(ks[0], (B, T, D), dtype=jnp.float32)
    w_ih = jax.random.uniform(ks[1], (4 * H, D), jnp.float32, -scale, scale)
    w_hh = jax.random.uniform(ks[2], (4 * H, H), jnp.float32, -scale, scale)
    b_ih = jax.random.uniform(ks[3], (4 * H,), jnp.float32, -scale, scale)
    b_hh = jax.random.uniform(ks[4], (4 * H,), jnp.float32, -scale, scale)
    fc_scale = 1.0 / jnp.sqrt(H)
    w_fc = jax.random.uniform(ks[5], (C, H), jnp.float32, -fc_scale, fc_scale)
    b_fc = jax.random.uniform(ks[6], (C,), jnp.float32, -fc_scale, fc_scale)

    out = rnn_forward_pallas(x, w_ih, w_hh, b_ih, b_hh, w_fc, b_fc)["out"]
    jax.block_until_ready(out)

    ref = rnn_forward_ref(x, w_ih, w_hh, b_ih, b_hh, w_fc, b_fc)
    assert out.shape == (B, C)
    assert jnp.allclose(out, ref, atol=1e-5, rtol=1e-5), (
        f"mismatch: max abs err {jnp.max(jnp.abs(out - ref))}")

    # TODO(synk): the optional embedding / mask (pack_padded_sequence) path is
    # not exercised here; only the mask=None, no-embedding forward is kernelized.
    print("KERNEL_OK")
</pallas_src>

<mosaic_0001>
module attributes {stable_mosaic.version = 11 : i64} {
  func.func @_lstm_fc_kernel(%arg0: i32, %arg1: memref<64x32xf32, #tpu.memory_space<vmem>>, %arg2: memref<32x128xf32, #tpu.memory_space<vmem>>, %arg3: memref<32x128xf32, #tpu.memory_space<vmem>>, %arg4: memref<1x128xf32, #tpu.memory_space<vmem>>, %arg5: memref<32x128xf32, #tpu.memory_space<vmem>>, %arg6: memref<1x128xf32, #tpu.memory_space<vmem>>, %arg7: memref<8x128xf32, #tpu.memory_space<vmem>>) attributes {dimension_semantics = [#tpu.dimension_semantics<parallel>], iteration_bounds = array<i64: 1>, scalar_prefetch = 0 : i64, scratch_operands = 0 : i64, tpu.core_type = #tpu.core_type<tc>, window_params = [{transform_indices = @transform_0, window_bounds = array<i64: 64, 32>}, {pipeline_mode = #tpu.pipeline_mode<synchronous>, transform_indices = @transform_1, window_bounds = array<i64: 32, 128>}, {pipeline_mode = #tpu.pipeline_mode<synchronous>, transform_indices = @transform_2, window_bounds = array<i64: 32, 128>}, {pipeline_mode = #tpu.pipeline_mode<synchronous>, transform_indices = @transform_3, window_bounds = array<i64: 1, 128>}, {pipeline_mode = #tpu.pipeline_mode<synchronous>, transform_indices = @transform_4, window_bounds = array<i64: 32, 128>}, {pipeline_mode = #tpu.pipeline_mode<synchronous>, transform_indices = @transform_5, window_bounds = array<i64: 1, 128>}, {transform_indices = @transform_6, window_bounds = array<i64: 8, 128>}]} {
    %c0 = arith.constant 0 : index
    %c0_0 = arith.constant 0 : index
    %0 = vector.load %arg2[%c0, %c0_0] : memref<32x128xf32, #tpu.memory_space<vmem>>, vector<32x128xf32>
    %c0_1 = arith.constant 0 : index
    %c0_2 = arith.constant 0 : index
    %1 = vector.load %arg3[%c0_1, %c0_2] : memref<32x128xf32, #tpu.memory_space<vmem>>, vector<32x128xf32>
    %c0_3 = arith.constant 0 : index
    %c0_4 = arith.constant 0 : index
    %2 = vector.load %arg4[%c0_3, %c0_4] : memref<1x128xf32, #tpu.memory_space<vmem>>, vector<1x128xf32>
    %c0_5 = arith.constant 0 : index
    %c0_6 = arith.constant 0 : index
    %3 = vector.load %arg1[%c0_5, %c0_6] : memref<64x32xf32, #tpu.memory_space<vmem>>, vector<64x32xf32>
    %cst = arith.constant dense<0.000000e+00> : vector<64x128xf32>
    %4 = tpu.matmul %3, %0, %cst {dimension_numbers = #tpu.dot_dimension_numbers<[1], [0], [0], [1], [0, 0, 1, 1], [], []>} : vector<64x32xf32>, vector<32x128xf32>, vector<64x128xf32> -> vector<64x128xf32>
    %5 = vector.broadcast %2 : vector<1x128xf32> to vector<64x128xf32>
    %6 = arith.addf %4, %5 : vector<64x128xf32>
    %7 = tpu.iota {dimensions = array<i32: 1>} : vector<8x128xi32>
    %c64_i32 = arith.constant 64 : i32
    %8 = vector.broadcast %c64_i32 : i32 to vector<8x128xi32>
    %9 = arith.cmpi sge, %7, %8 : vector<8x128xi32>
    %c96_i32 = arith.constant 96 : i32
    %10 = vector.broadcast %c96_i32 : i32 to vector<8x128xi32>
    %11 = arith.cmpi slt, %7, %10 : vector<8x128xi32>
    %12 = arith.andi %9, %11 : vector<8x128xi1>
    %cst_7 = arith.constant 0.000000e+00 : f32
    %13 = vector.broadcast %cst_7 : f32 to vector<8x32xf32>
    %cst_8 = arith.constant 0.000000e+00 : f32
    %14 = vector.broadcast %cst_8 : f32 to vector<8x32xf32>
    %15 = vector.extract_strided_slice %6 {offsets = [0, 0], sizes = [8, 128], strides = [1, 1]} : vector<64x128xf32> to vector<8x128xf32>
    %cst_9 = arith.constant dense<0.000000e+00> : vector<8x128xf32>
    %16 = tpu.matmul %13, %1, %cst_9 {dimension_numbers = #tpu.dot_dimension_numbers<[1], [0], [0], [1], [0, 0, 1, 1], [], []>} : vector<8x32xf32>, vector<32x128xf32>, vector<8x128xf32> -> vector<8x128xf32>
    %17 = arith.addf %15, %16 : vector<8x128xf32>
    %18 = math.tanh %17 : vector<8x128xf32>
    %19 = arith.negf %17 : vector<8x128xf32>
    %20 = math.exp %19 : vector<8x128xf32>
    %cst_10 = arith.constant 1.000000e+00 : f32
    %21 = vector.broadcast %cst_10 : f32 to vector<8x128xf32>
    %22 = arith.addf %21, %20 : vector<8x128xf32>
    %23 = arith.divf %21, %22 : vector<8x128xf32>
    %24 = arith.select %12, %18, %23 : vector<8x128xi1>, vector<8x128xf32>
    %25 = vector.extract_strided_slice %24 {offsets = [0, 0], sizes = [8, 32], strides = [1, 1]} : vector<8x128xf32> to vector<8x32xf32>
    %26 = vector.extract_strided_slice %24 {offsets = [0, 32], sizes = [8, 32], strides = [1, 1]} : vector<8x128xf32> to vector<8x32xf32>
    %27 = vector.extract_strided_slice %24 {offsets = [0, 64], sizes = [8, 32], strides = [1, 1]} : vector<8x128xf32> to vector<8x32xf32>
    %28 = vector.extract_strided_slice %24 {offsets = [0, 96], sizes = [8, 32], strides = [1, 1]} : vector<8x128xf32> to vector<8x32xf32>
    %29 = arith.mulf %26, %14 : vector<8x32xf32>
    %30 = arith.mulf %25, %27 : vector<8x32xf32>
    %31 = arith.addf %29, %30 : vector<8x32xf32>
    %32 = math.tanh %31 : vector<8x32xf32>
    %33 = arith.mulf %28, %32 : vector<8x32xf32>
    %34 = vector.extract_strided_slice %6 {offsets = [8, 0], sizes = [8, 128], strides = [1, 1]} : vector<64x128xf32> to vector<8x128xf32>
    %cst_11 = arith.constant dense<0.000000e+00> : vector<8x128xf32>
    %35 = tpu.matmul %33, %1, %cst_11 {dimension_numbers = #tpu.dot_dimension_numbers<[1], [0], [0], [1], [0, 0, 1, 1], [], []>} : vector<8x32xf32>, vector<32x128xf32>, vector<8x128xf32> -> vector<8x128xf32>
    %36 = arith.addf %34, %35 : vector<8x128xf32>
    %37 = math.tanh %36 : vector<8x128xf32>
    %38 = arith.negf %36 : vector<8x128xf32>
    %39 = math.exp %38 : vector<8x128xf32>
    %cst_12 = arith.constant 1.000000e+00 : f32
    %40 = vector.broadcast %cst_12 : f32 to vector<8x128xf32>
    %41 = arith.addf %40, %39 : vector<8x128xf32>
    %42 = arith.divf %40, %41 : vector<8x128xf32>
    %43 = arith.select %12, %37, %42 : vector<8x128xi1>, vector<8x128xf32>
    %44 = vector.extract_strided_slice %43 {offsets = [0, 0], sizes = [8, 32], strides = [1, 1]} : vector<8x128xf32> to vector<8x32xf32>
    %45 = vector.extract_strided_slice %43 {offsets = [0, 32], sizes = [8, 32], strides = [1, 1]} : vector<8x128xf32> to vector<8x32xf32>
    %46 = vector.extract_strided_slice %43 {offsets = [0, 64], sizes = [8, 32], strides = [1, 1]} : vector<8x128xf32> to vector<8x32xf32>
    %47 = vector.extract_strided_slice %43 {offsets = [0, 96], sizes = [8, 32], strides = [1, 1]} : vector<8x128xf32> to vector<8x32xf32>
    %48 = arith.mulf %45, %31 : vector<8x32xf32>
    %49 = arith.mulf %44, %46 : vector<8x32xf32>
    %50 = arith.addf %48, %49 : vector<8x32xf32>
    %51 = math.tanh %50 : vector<8x32xf32>
    %52 = arith.mulf %47, %51 : vector<8x32xf32>
    %53 = vector.extract_strided_slice %6 {offsets = [16, 0], sizes = [8, 128], strides = [1, 1]} : vector<64x128xf32> to vector<8x128xf32>
    %cst_13 = arith.constant dense<0.000000e+00> : vector<8x128xf32>
    %54 = tpu.matmul %52, %1, %cst_13 {dimension_numbers = #tpu.dot_dimension_numbers<[1], [0], [0], [1], [0, 0, 1, 1], [], []>} : vector<8x32xf32>, vector<32x128xf32>, vector<8x128xf32> -> vector<8x128xf32>
    %55 = arith.addf %53, %54 : vector<8x128xf32>
    %56 = math.tanh %55 : vector<8x128xf32>
    %57 = arith.negf %55 : vector<8x128xf32>
    %58 = math.exp %57 : vector<8x128xf32>
    %cst_14 = arith.constant 1.000000e+00 : f32
    %59 = vector.broadcast %cst_14 : f32 to vector<8x128xf32>
    %60 = arith.addf %59, %58 : vector<8x128xf32>
    %61 = arith.divf %59, %60 : vector<8x128xf32>
    %62 = arith.select %12, %56, %61 : vector<8x128xi1>, vector<8x128xf32>
    %63 = vector.extract_strided_slice %62 {offsets = [0, 0], sizes = [8, 32], strides = [1, 1]} : vector<8x128xf32> to vector<8x32xf32>
    %64 = vector.extract_strided_slice %62 {offsets = [0, 32], sizes = [8, 32], strides = [1, 1]} : vector<8x128xf32> to vector<8x32xf32>
    %65 = vector.extract_strided_slice %62 {offsets = [0, 64], sizes = [8, 32], strides = [1, 1]} : vector<8x128xf32> to vector<8x32xf32>
    %66 = vector.extract_strided_slice %62 {offsets = [0, 96], sizes = [8, 32], strides = [1, 1]} : vector<8x128xf32> to vector<8x32xf32>
    %67 = arith.mulf %64, %50 : vector<8x32xf32>
    %68 = arith.mulf %63, %65 : vector<8x32xf32>
    %69 = arith.addf %67, %68 : vector<8x32xf32>
    %70 = math.tanh %69 : vector<8x32xf32>
    %71 = arith.mulf %66, %70 : vector<8x32xf32>
    %72 = vector.extract_strided_slice %6 {offsets = [24, 0], sizes = [8, 128], strides = [1, 1]} : vector<64x128xf32> to vector<8x128xf32>
    %cst_15 = arith.constant dense<0.000000e+00> : vector<8x128xf32>
    %73 = tpu.matmul %71, %1, %cst_15 {dimension_numbers = #tpu.dot_dimension_numbers<[1], [0], [0], [1], [0, 0, 1, 1], [], []>} : vector<8x32xf32>, vector<32x128xf32>, vector<8x128xf32> -> vector<8x128xf32>
    %74 = arith.addf %72, %73 : vector<8x128xf32>
    %75 = math.tanh %74 : vector<8x128xf32>
    %76 = arith.negf %74 : vector<8x128xf32>
    %77 = math.exp %76 : vector<8x128xf32>
    %cst_16 = arith.constant 1.000000e+00 : f32
    %78 = vector.broadcast %cst_16 : f32 to vector<8x128xf32>
    %79 = arith.addf %78, %77 : vector<8x128xf32>
    %80 = arith.divf %78, %79 : vector<8x128xf32>
    %81 = arith.select %12, %75, %80 : vector<8x128xi1>, vector<8x128xf32>
    %82 = vector.extract_strided_slice %81 {offsets = [0, 0], sizes = [8, 32], strides = [1, 1]} : vector<8x128xf32> to vector<8x32xf32>
    %83 = vector.extract_strided_slice %81 {offsets = [0, 32], sizes = [8, 32], strides = [1, 1]} : vector<8x128xf32> to vector<8x32xf32>
    %84 = vector.extract_strided_slice %81 {offsets = [0, 64], sizes = [8, 32], strides = [1, 1]} : vector<8x128xf32> to vector<8x32xf32>
    %85 = vector.extract_strided_slice %81 {offsets = [0, 96], sizes = [8, 32], strides = [1, 1]} : vector<8x128xf32> to vector<8x32xf32>
    %86 = arith.mulf %83, %69 : vector<8x32xf32>
    %87 = arith.mulf %82, %84 : vector<8x32xf32>
    %88 = arith.addf %86, %87 : vector<8x32xf32>
    %89 = math.tanh %88 : vector<8x32xf32>
    %90 = arith.mulf %85, %89 : vector<8x32xf32>
    %91 = vector.extract_strided_slice %6 {offsets = [32, 0], sizes = [8, 128], strides = [1, 1]} : vector<64x128xf32> to vector<8x128xf32>
    %cst_17 = arith.constant dense<0.000000e+00> : vector<8x128xf32>
    %92 = tpu.matmul %90, %1, %cst_17 {dimension_numbers = #tpu.dot_dimension_numbers<[1], [0], [0], [1], [0, 0, 1, 1], [], []>} : vector<8x32xf32>, vector<32x128xf32>, vector<8x128xf32> -> vector<8x128xf32>
    %93 = arith.addf %91, %92 : vector<8x128xf32>
    %94 = math.tanh %93 : vector<8x128xf32>
    %95 = arith.negf %93 : vector<8x128xf32>
    %96 = math.exp %95 : vector<8x128xf32>
    %cst_18 = arith.constant 1.000000e+00 : f32
    %97 = vector.broadcast %cst_18 : f32 to vector<8x128xf32>
    %98 = arith.addf %97, %96 : vector<8x128xf32>
    %99 = arith.divf %97, %98 : vector<8x128xf32>
    %100 = arith.select %12, %94, %99 : vector<8x128xi1>, vector<8x128xf32>
    %101 = vector.extract_strided_slice %100 {offsets = [0, 0], sizes = [8, 32], strides = [1, 1]} : vector<8x128xf32> to vector<8x32xf32>
    %102 = vector.extract_strided_slice %100 {offsets = [0, 32], sizes = [8, 32], strides = [1, 1]} : vector<8x128xf32> to vector<8x32xf32>
    %103 = vector.extract_strided_slice %100 {offsets = [0, 64], sizes = [8, 32], strides = [1, 1]} : vector<8x128xf32> to vector<8x32xf32>
    %104 = vector.extract_strided_slice %100 {offsets = [0, 96], sizes = [8, 32], strides = [1, 1]} : vector<8x128xf32> to vector<8x32xf32>
    %105 = arith.mulf %102, %88 : vector<8x32xf32>
    %106 = arith.mulf %101, %103 : vector<8x32xf32>
    %107 = arith.addf %105, %106 : vector<8x32xf32>
    %108 = math.tanh %107 : vector<8x32xf32>
    %109 = arith.mulf %104, %108 : vector<8x32xf32>
    %110 = vector.extract_strided_slice %6 {offsets = [40, 0], sizes = [8, 128], strides = [1, 1]} : vector<64x128xf32> to vector<8x128xf32>
    %cst_19 = arith.constant dense<0.000000e+00> : vector<8x128xf32>
    %111 = tpu.matmul %109, %1, %cst_19 {dimension_numbers = #tpu.dot_dimension_numbers<[1], [0], [0], [1], [0, 0, 1, 1], [], []>} : vector<8x32xf32>, vector<32x128xf32>, vector<8x128xf32> -> vector<8x128xf32>
    %112 = arith.addf %110, %111 : vector<8x128xf32>
    %113 = math.tanh %112 : vector<8x128xf32>
    %114 = arith.negf %112 : vector<8x128xf32>
    %115 = math.exp %114 : vector<8x128xf32>
    %cst_20 = arith.constant 1.000000e+00 : f32
    %116 = vector.broadcast %cst_20 : f32 to vector<8x128xf32>
    %117 = arith.addf %116, %115 : vector<8x128xf32>
    %118 = arith.divf %116, %117 : vector<8x128xf32>
    %119 = arith.select %12, %113, %118 : vector<8x128xi1>, vector<8x128xf32>
    %120 = vector.extract_strided_slice %119 {offsets = [0, 0], sizes = [8, 32], strides = [1, 1]} : vector<8x128xf32> to vector<8x32xf32>
    %121 = vector.extract_strided_slice %119 {offsets = [0, 32], sizes = [8, 32], strides = [1, 1]} : vector<8x128xf32> to vector<8x32xf32>
    %122 = vector.extract_strided_slice %119 {offsets = [0, 64], sizes = [8, 32], strides = [1, 1]} : vector<8x128xf32> to vector<8x32xf32>
    %123 = vector.extract_strided_slice %119 {offsets = [0, 96], sizes = [8, 32], strides = [1, 1]} : vector<8x128xf32> to vector<8x32xf32>
    %124 = arith.mulf %121, %107 : vector<8x32xf32>
    %125 = arith.mulf %120, %122 : vector<8x32xf32>
    %126 = arith.addf %124, %125 : vector<8x32xf32>
    %127 = math.tanh %126 : vector<8x32xf32>
    %128 = arith.mulf %123, %127 : vector<8x32xf32>
    %129 = vector.extract_strided_slice %6 {offsets = [48, 0], sizes = [8, 128], strides = [1, 1]} : vector<64x128xf32> to vector<8x128xf32>
    %cst_21 = arith.constant dense<0.000000e+00> : vector<8x128xf32>
    %130 = tpu.matmul %128, %1, %cst_21 {dimension_numbers = #tpu.dot_dimension_numbers<[1], [0], [0], [1], [0, 0, 1, 1], [], []>} : vector<8x32xf32>, vector<32x128xf32>, vector<8x128xf32> -> vector<8x128xf32>
    %131 = arith.addf %129, %130 : vector<8x128xf32>
    %132 = math.tanh %131 : vector<8x128xf32>
    %133 = arith.negf %131 : vector<8x128xf32>
    %134 = math.exp %133 : vector<8x128xf32>
    %cst_22 = arith.constant 1.000000e+00 : f32
    %135 = vector.broadcast %cst_22 : f32 to vector<8x128xf32>
    %136 = arith.addf %135, %134 : vector<8x128xf32>
    %137 = arith.divf %135, %136 : vector<8x128xf32>
    %138 = arith.select %12, %132, %137 : vector<8x128xi1>, vector<8x128xf32>
    %139 = vector.extract_strided_slice %138 {offsets = [0, 0], sizes = [8, 32], strides = [1, 1]} : vector<8x128xf32> to vector<8x32xf32>
    %140 = vector.extract_strided_slice %138 {offsets = [0, 32], sizes = [8, 32], strides = [1, 1]} : vector<8x128xf32> to vector<8x32xf32>
    %141 = vector.extract_strided_slice %138 {offsets = [0, 64], sizes = [8, 32], strides = [1, 1]} : vector<8x128xf32> to vector<8x32xf32>
    %142 = vector.extract_strided_slice %138 {offsets = [0, 96], sizes = [8, 32], strides = [1, 1]} : vector<8x128xf32> to vector<8x32xf32>
    %143 = arith.mulf %140, %126 : vector<8x32xf32>
    %144 = arith.mulf %139, %141 : vector<8x32xf32>
    %145 = arith.addf %143, %144 : vector<8x32xf32>
    %146 = math.tanh %145 : vector<8x32xf32>
    %147 = arith.mulf %142, %146 : vector<8x32xf32>
    %148 = vector.extract_strided_slice %6 {offsets = [56, 0], sizes = [8, 128], strides = [1, 1]} : vector<64x128xf32> to vector<8x128xf32>
    %cst_23 = arith.constant dense<0.000000e+00> : vector<8x128xf32>
    %149 = tpu.matmul %147, %1, %cst_23 {dimension_numbers = #tpu.dot_dimension_numbers<[1], [0], [0], [1], [0, 0, 1, 1], [], []>} : vector<8x32xf32>, vector<32x128xf32>, vector<8x128xf32> -> vector<8x128xf32>
    %150 = arith.addf %148, %149 : vector<8x128xf32>
    %151 = math.tanh %150 : vector<8x128xf32>
    %152 = arith.negf %150 : vector<8x128xf32>
    %153 = math.exp %152 : vector<8x128xf32>
    %cst_24 = arith.constant 1.000000e+00 : f32
    %154 = vector.broadcast %cst_24 : f32 to vector<8x128xf32>
    %155 = arith.addf %154, %153 : vector<8x128xf32>
    %156 = arith.divf %154, %155 : vector<8x128xf32>
    %157 = arith.select %12, %151, %156 : vector<8x128xi1>, vector<8x128xf32>
    %158 = vector.extract_strided_slice %157 {offsets = [0, 0], sizes = [8, 32], strides = [1, 1]} : vector<8x128xf32> to vector<8x32xf32>
    %159 = vector.extract_strided_slice %157 {offsets = [0, 32], sizes = [8, 32], strides = [1, 1]} : vector<8x128xf32> to vector<8x32xf32>
    %160 = vector.extract_strided_slice %157 {offsets = [0, 64], sizes = [8, 32], strides = [1, 1]} : vector<8x128xf32> to vector<8x32xf32>
    %161 = vector.extract_strided_slice %157 {offsets = [0, 96], sizes = [8, 32], strides = [1, 1]} : vector<8x128xf32> to vector<8x32xf32>
    %162 = arith.mulf %159, %145 : vector<8x32xf32>
    %163 = arith.mulf %158, %160 : vector<8x32xf32>
    %164 = arith.addf %162, %163 : vector<8x32xf32>
    %165 = math.tanh %164 : vector<8x32xf32>
    %166 = arith.mulf %161, %165 : vector<8x32xf32>
    %c0_25 = arith.constant 0 : index
    %c0_26 = arith.constant 0 : index
    %167 = vector.load %arg5[%c0_25, %c0_26] : memref<32x128xf32, #tpu.memory_space<vmem>>, vector<32x128xf32>
    %cst_27 = arith.constant dense<0.000000e+00> : vector<8x128xf32>
    %168 = tpu.matmul %166, %167, %cst_27 {dimension_numbers = #tpu.dot_dimension_numbers<[1], [0], [0], [1], [0, 0, 1, 1], [], []>} : vector<8x32xf32>, vector<32x128xf32>, vector<8x128xf32> -> vector<8x128xf32>
    %c0_28 = arith.constant 0 : index
    %c0_29 = arith.constant 0 : index
    %169 = vector.load %arg6[%c0_28, %c0_29] : memref<1x128xf32, #tpu.memory_space<vmem>>, vector<1x128xf32>
    %170 = vector.broadcast %169 : vector<1x128xf32> to vector<8x128xf32>
    %171 = arith.addf %168, %170 : vector<8x128xf32>
    %c0_30 = arith.constant 0 : index
    %c0_31 = arith.constant 0 : index
    %172 = vector.load %arg7[%c0_30, %c0_31] : memref<8x128xf32, #tpu.memory_space<vmem>>, vector<8x128xf32>
    tpu.vector_store %arg7[%c0_30, %c0_31], %171 {strides = array<i32>} : memref<8x128xf32, #tpu.memory_space<vmem>>, vector<8x128xf32>,
    return
  }
  func.func @transform_0(%arg0: i32) -> (i32, i32) {
    %c0_i32 = arith.constant 0 : i32
    %c0_i32_0 = arith.constant 0 : i32
    return %arg0, %c0_i32 : i32, i32
  }
  func.func @transform_1(%arg0: i32) -> (i32, i32) {
    %c0_i32 = arith.constant 0 : i32
    %c0_i32_0 = arith.constant 0 : i32
    %c0_i32_1 = arith.constant 0 : i32
    return %c0_i32, %c0_i32_0 : i32, i32
  }
  func.func @transform_2(%arg0: i32) -> (i32, i32) {
    %c0_i32 = arith.constant 0 : i32
    %c0_i32_0 = arith.constant 0 : i32
    %c0_i32_1 = arith.constant 0 : i32
    return %c0_i32, %c0_i32_0 : i32, i32
  }
  func.func @transform_3(%arg0: i32) -> (i32, i32) {
    %c0_i32 = arith.constant 0 : i32
    %c0_i32_0 = arith.constant 0 : i32
    %c0_i32_1 = arith.constant 0 : i32
    return %c0_i32, %c0_i32_0 : i32, i32
  }
  func.func @transform_4(%arg0: i32) -> (i32, i32) {
    %c0_i32 = arith.constant 0 : i32
    %c0_i32_0 = arith.constant 0 : i32
    %c0_i32_1 = arith.constant 0 : i32
    return %c0_i32, %c0_i32_0 : i32, i32
  }
  func.func @transform_5(%arg0: i32) -> (i32, i32) {
    %c0_i32 = arith.constant 0 : i32
    %c0_i32_0 = arith.constant 0 : i32
    %c0_i32_1 = arith.constant 0 : i32
    return %c0_i32, %c0_i32_0 : i32, i32
  }
  func.func @transform_6(%arg0: i32) -> (i32, i32) {
    %c0_i32 = arith.constant 0 : i32
    %c0_i32_0 = arith.constant 0 : i32
    return %arg0, %c0_i32 : i32, i32
  }
}

</mosaic_0001>

<bundles_post_ra>
// kernel: tpu_custom_call.1
= control target key start
LH: loop header
LB: loop body
LE: loop exit
PB: predicated region body
PF: predicated region fallthrough
CT: control target
= control target key end

     0   :  { %vm47_vm0 = vcmask 261120   ;;  %v1447_v4 = vmov 0.0|0.0   ;;  %vm1448_vm1 = vmmov 0   ;;  %v1449_v13 = vmov 0.0   ;;  %s1713_s0 = inlined_call_operand.vmem [shape: f32[64,32], index: 0, kind: input, shape index: {}]   ;;  %s1714_s1 = inlined_call_operand.vmem [shape: f32[32,128], index: 1, kind: input, shape index: {}]   ;;  %s1715_s2 = inlined_call_operand.vmem [shape: f32[32,128], index: 2, kind: input, shape index: {}]   ;;  %s1716_s3 = inlined_call_operand.vmem [shape: f32[1,128], index: 3, kind: input, shape index: {}]   ;;  %s1717_s4 = inlined_call_operand.vmem [shape: f32[32,128], index: 4, kind: input, shape index: {}]   ;;  %s1718_s5 = inlined_call_operand.vmem [shape: f32[1,128], index: 5, kind: input, shape index: {}]   ;;  %s1719_s6 = inlined_call_operand.hbm [shape: f32[8,128], index: 6, kind: output, shape index: {}]  }
   0x1   :  { %v24_v0 = vld [vmem:[%s1714_s1] sm:$0xff]  ;;  %v25_v1 = vld [vmem:[%s1714_s1 + $0x8] sm:$0xff]  ;;  %1299 = vmatprep.subr.bf16.mxu1 %v1447_v4  ;;  %v26_v6 = vld [vmem:[%s1714_s1 + $0x10] sm:$0xff]  ;;  %1200 = vmatprep.mubr.msk.f32.mxu1 %vm1448_vm1, %v1449_v13 }
   0x2   :  { %v28_v2 = vld [vmem:[%s1715_s2] sm:$0xff]  ;;  %v1291_v3 = vpack.c.bf16 %v25_v1, %v24_v0  ;;  %v29_v5 = vld [vmem:[%s1715_s2 + $0x8] sm:$0xff]  ;;  %v27_v7 = vld [vmem:[%s1714_s1 + $0x18] sm:$0xff] }
   0x3   :  { %v1507_v8 = vpack.c.bf16 %v29_v5, %v28_v2  ;;  %v1295_v9 = vpack.c.bf16 %v27_v7, %v26_v6  ;;  %v33_v10 = vld [vmem:[%s1713_s0] sm:$0xff]  ;;  %v30_v11 = vld [vmem:[%s1715_s2 + $0x10] sm:$0xff]  ;;  %v31_v12 = vld [vmem:[%s1715_s2 + $0x18] sm:$0xff] }
   0x4   :  { %1292 = vmatprep.subr.bf16.mxu0 %v1291_v3  ;;  %1180 = vmatprep.mubr.msk.f32.mxu0 %vm47_vm0, %v33_v10 }
   0x5   :  { %11 = vsyncpa [#allocation3], 0  ;;  %1294 = vmatpush3.bf16.msra.mxu0 %v1291_v3  ;;  %1301 = vmatpush3.bf16.msra.mxu1 %v1507_v8  ;;  %v1522_v14 = vpack.c.bf16 %v31_v12, %v30_v11  ;;  %v34_v15 = vld [vmem:[%s1713_s0 + $0x8] sm:$0xff]  ;;  %v1546_v16 = vld [vmem:[%s1716_s3] ss:$0 sm:$0xff]  ;;  %v177_v25 = vlaneseq  ;;  %s1450_s3 = smov 64  }
   0x6   :  { %1296 = vmatprep.subr.bf16.mxu0 %v1295_v9  ;;  %1302 = vmatprep.subr.bf16.mxu1 %v1447_v4  ;;  %s1451_s17 = smov 32   ;;  %v35_v56 = vld [vmem:[%s1713_s0 + $0x10] sm:$0xff]  ;;  %v36_v57 = vld [vmem:[%s1713_s0 + $0x18] sm:$0xff]  ;;  %v37_v58 = vld [vmem:[%s1713_s0 + $0x20] sm:$0xff] }
   0x7   :  { %v178_v27 = vand.u32 127, %v177_v25  ;;  %v38_v59 = vld [vmem:[%s1713_s0 + $0x28] sm:$0xff]  ;;  %v39_v60 = vld [vmem:[%s1713_s0 + $0x30] sm:$0xff]  ;;  %v40_v61 = vld [vmem:[%s1713_s0 + $0x38] sm:$0xff] }
   0x8   :  { %v990_v28 = vld [vmem:[%s1717_s4 + $0x10] sm:$0xff] }
   0x9   :  { %1298 = vmatpush3.bf16.msra.mxu0 %v1295_v9  ;;  %1304 = vmatpush3.bf16.msra.mxu1 %v1522_v14  ;;  %vm179_vm2 = vcmp.ge.s32.totalorder %v178_v27, 64  ;;  %vm180_vm3 = vcmp.lt.s32.totalorder %v178_v27, 96 }
   0xa   :  { %1305 = vmatprep.subr.bf16.mxu1 %v1447_v4  ;;  %1311 = vmatprep.subr.bf16.mxu0 %v1447_v4  ;;  %vm1549_vm4 = vmand %vm179_vm2, %vm180_vm3 }
   0xc   :  { %1181 = vmatmul.mubr.msk.f32.vlgmr.msra.gmra.mrb[0].mxu0 %vm47_vm0, %v34_v15  ;;  %1201 = vmatmul.mubr.f32.vlgmr.msra.gmra.mrb[0].mxu1 %v1449_v13 }
   0xd   :  { %1307 = vmatpush3.bf16.msra.mxu1 %v1507_v8  ;;  %1211 = vmatprep.mubr.msk.f32.mxu1 %vm1448_vm1, %v1449_v13 }
   0xe   :  { %1308 = vmatprep.subr.bf16.mxu1 %v1447_v4  ;;  %1313 = vmatpush3.bf16.msra.mxu0 %v1507_v8 }
   0xf   :  { %1314 = vmatprep.subr.bf16.mxu0 %v1447_v4  ;;  %1183 = vmatprep.mubr.msk.f32.mxu0 %vm47_vm0, %v35_v56 }
  0x10   :  { %1184 = vmatmul.mubr.msk.f32.gmra.mrb[2].mxu0 %vm47_vm0, %v36_v57 }
  0x11   :  { %1310 = vmatpush3.bf16.msra.mxu1 %v1522_v14  ;;  %1186 = vmatprep.mubr.msk.f32.mxu0 %vm47_vm0, %v37_v58 }
  0x12   :  { %1316 = vmatpush3.bf16.msra.mxu0 %v1522_v14  ;;  %1317 = vmatprep.subr.bf16.mxu1 %v1447_v4 }
  0x13   :  { %1323 = vmatprep.subr.bf16.mxu0 %v1447_v4 }
  0x14   :  { %1187 = vmatmul.mubr.msk.f32.gmra.mrb[4].mxu0 %vm47_vm0, %v38_v59 }
  0x15   :  { %1189 = vmatprep.mubr.msk.f32.mxu0 %vm47_vm0, %v39_v60 }
  0x18   :  { %1190 = vmatmul.mubr.msk.f32.gmra.mrb[6].mxu0 %vm47_vm0, %v40_v61 }
  0x19   :  { %1222 = vmatprep.mubr.msk.f32.mxu0 %vm1448_vm1, %v1449_v13 }
  0xdf   :  { %v1182_v17 = vpop.f32.mrb[0].mxu0  ;;  %v251_v18 = vpop.f32.mrb[0].mxu1 }
  0xe0   :  { %v138_v19 = vpop.f32.mrb[1].mxu0  ;;  %v1202_v20 = vpop.f32.mrb[1].mxu1  ;;  %v144_v41 = vadd.f32 %v1182_v17, %v1546_v16 }
  0xe1   :  { %v139_v21 = vadd.f32 %v1546_v16, %v138_v19 }
  0xe3   :  { %v255_v22 = vadd.f32 %v251_v18, %v139_v21  ;;  %v1185_v1 = vpop.f32.mrb[2].mxu0 }
  0xe4   :  { %v148_v2 = vpop.f32.mrb[3].mxu0 }
  0xe5   :  { %v1098_v23 = vmul.f32 -1.442695, %v255_v22  ;;  %v149_v10 = vadd.f32 %v1546_v16, %v148_v2 }
  0xe7   :  { %1359 = vpow2.f32 %v1098_v23  ;;  %v1599_v3 = vpop.f32.mrb[4].mxu0 }
  0xe8   :  { %1361 = vtanh.f32 %v255_v22  ;;  %v1601_v5 = vpop.f32.mrb[5].mxu0 }
  0xeb   :  { %v1603_v6 = vpop.f32.mrb[6].mxu0 }
  0xec   :  { %v1605_v7 = vpop.f32.mrb[7].mxu0 }
  0xf1   :  { %v1360_v24 = vpop.eup %1359 }
  0xf2   :  { %v260_v26 = vadd.f32 1.0, %v1360_v24  ;;  %v1362_v29 = vpop.eup %1361 }
  0xf4   :  { %1363 = vrcp.f32 %v260_v26 }
  0xfe   :  { %v1364_v30 = vpop.eup %1363 }
  0xff   :  { %v263_v31 = vsel %vm1549_vm4, %v1362_v29, %v1364_v30 }
 0x100   :  { %266 = vrot.lane.b32.xlu0 %v263_v31, %s1450_s3  ;;  %v264_v34 = vmul.f32 0.0, %v263_v31 }
 0x172   :  { %v267_v32 = vpop.permute.xlu0 %266 }
 0x173   :  { %v269_v33 = vmul.f32 %v267_v32, %v263_v31 }
 0x175   :  { %271 = vrot.lane.b32.xlu0 %v269_v33, %s1451_s17  ;;  %v154_v33 = vadd.f32 %v1185_v1, %v1546_v16 }
 0x1e7   :  { %v272_v35 = vpop.permute.xlu0 %271 }
 0x1e8   :  { %v274_v36 = vadd.f32 %v272_v35, %v264_v34 }
 0x1ea   :  { %1365 = vtanh.f32 %v274_v36 }
 0x1f4   :  { %v1366_v37 = vpop.eup %1365 }
 0x1f5   :  { %277 = vrot.lane.b32.xlu1 %v1366_v37, %s1450_s3 }
 0x267   :  { %v278_v38 = vpop.permute.xlu1 %277 }
 0x268   :  { %v280_v39 = vmul.f32 %v278_v38, %v263_v31 }
 0x26a   :  { %282 = vrot.lane.b32.xlu1 %v280_v39, %s1451_s17 }
 0x2dc   :  { %v283_v40 = vpop.permute.xlu1 %282 }
 0x2dd   :  { %1212 = vmatmul.mubr.msk.f32.vlgmr.msra.gmra.mrb[2].mxu1 %vm47_vm0, %v283_v40 }
 0x2de   :  { %1319 = vmatpush3.bf16.msra.mxu1 %v1507_v8  ;;  %1233 = vmatprep.mubr.msk.f32.mxu1 %vm1448_vm1, %v1449_v13 }
 0x2df   :  { %1320 = vmatprep.subr.bf16.mxu1 %v1447_v4 }
 0x2e2   :  { %1322 = vmatpush3.bf16.msra.mxu1 %v1522_v14 }
 0x2e3   :  { %1329 = vmatprep.subr.bf16.mxu1 %v1447_v4 }
 0x3b0   :  { %v352_v42 = vpop.f32.mrb[2].mxu1 }
 0x3b1   :  { %v356_v43 = vadd.f32 %v352_v42, %v144_v41  ;;  %v1213_v44 = vpop.f32.mrb[3].mxu1 }
 0x3b3   :  { %v1100_v45 = vmul.f32 -1.442695, %v356_v43 }
 0x3b5   :  { %1367 = vpow2.f32 %v1100_v45 }
 0x3b6   :  { %1369 = vtanh.f32 %v356_v43 }
 0x3bf   :  { %v1368_v46 = vpop.eup %1367 }
 0x3c0   :  { %v361_v47 = vadd.f32 1.0, %v1368_v46  ;;  %v1370_v48 = vpop.eup %1369 }
 0x3c2   :  { %1371 = vrcp.f32 %v361_v47 }
 0x3cc   :  { %v1372_v49 = vpop.eup %1371 }
 0x3cd   :  { %v364_v50 = vsel %vm1549_vm4, %v1370_v48, %v1372_v49 }
 0x3ce   :  { %367 = vrot.lane.b32.xlu0 %v364_v50, %s1450_s3  ;;  %v365_v53 = vmul.f32 %v364_v50, %v274_v36 }
 0x440   :  { %v368_v51 = vpop.permute.xlu0 %367 }
 0x441   :  { %v370_v52 = vmul.f32 %v368_v51, %v364_v50 }
 0x443   :  { %372 = vrot.lane.b32.xlu1 %v370_v52, %s1451_s17  ;;  %v159_v52 = vadd.f32 %v1546_v16, %v1601_v5 }
 0x4b5   :  { %v373_v54 = vpop.permute.xlu1 %372 }
 0x4b6   :  { %v375_v55 = vadd.f32 %v373_v54, %v365_v53 }
 0x4b8   :  { %1373 = vtanh.f32 %v375_v55 }
 0x4c2   :  { %v1374_v62 = vpop.eup %1373 }
 0x4c3   :  { %378 = vrot.lane.b32.xlu0 %v1374_v62, %s1450_s3 }
 0x535   :  { %v379_v63 = vpop.permute.xlu0 %378 }
 0x536   :  { %v381_v0 = vmul.f32 %v379_v63, %v364_v50 }
 0x538   :  { %383 = vrot.lane.b32.xlu1 %v381_v0, %s1451_s17 }
 0x5aa   :  { %v384_v9 = vpop.permute.xlu1 %383 }
 0x5ab   :  { %1223 = vmatmul.mubr.msk.f32.vlgmr.msra.gmra.mrb[8].mxu0 %vm47_vm0, %v384_v9 }
 0x5ac   :  { %1325 = vmatpush3.bf16.msra.mxu0 %v1507_v8  ;;  %1244 = vmatprep.mubr.msk.f32.mxu0 %vm1448_vm1, %v1449_v13 }
 0x5ad   :  { %1326 = vmatprep.subr.bf16.mxu0 %v1447_v4 }
 0x5b0   :  { %1328 = vmatpush3.bf16.msra.mxu0 %v1522_v14 }
 0x5b1   :  { %1335 = vmatprep.subr.bf16.mxu0 %v1447_v4 }
 0x67e   :  { %v453_v11 = vpop.f32.mrb[8].mxu0 }
 0x67f   :  { %v457_v12 = vadd.f32 %v453_v11, %v149_v10  ;;  %v1224_v15 = vpop.f32.mrb[9].mxu0 }
 0x681   :  { %v1102_v17 = vmul.f32 -1.442695, %v457_v12 }
 0x683   :  { %1375 = vpow2.f32 %v1102_v17 }
 0x684   :  { %1377 = vtanh.f32 %v457_v12  ;;  %v164_v12 = vadd.f32 %v1599_v3, %v1546_v16 }
 0x68d   :  { %v1376_v18 = vpop.eup %1375 }
 0x68e   :  { %v462_v19 = vadd.f32 1.0, %v1376_v18  ;;  %v1378_v20 = vpop.eup %1377 }
 0x690   :  { %1379 = vrcp.f32 %v462_v19 }
 0x69a   :  { %v1380_v21 = vpop.eup %1379 }
 0x69b   :  { %v465_v22 = vsel %vm1549_vm4, %v1378_v20, %v1380_v21 }
 0x69c   :  { %468 = vrot.lane.b32.xlu0 %v465_v22, %s1450_s3  ;;  %v466_v25 = vmul.f32 %v465_v22, %v375_v55 }
 0x70e   :  { %v469_v23 = vpop.permute.xlu0 %468 }
 0x70f   :  { %v471_v24 = vmul.f32 %v469_v23, %v465_v22 }
 0x711   :  { %473 = vrot.lane.b32.xlu1 %v471_v24, %s1451_s17 }
 0x783   :  { %v474_v26 = vpop.permute.xlu1 %473 }
 0x784   :  { %v476_v27 = vadd.f32 %v474_v26, %v466_v25 }
 0x786   :  { %1381 = vtanh.f32 %v476_v27 }
 0x790   :  { %v1382_v29 = vpop.eup %1381 }
 0x791   :  { %479 = vrot.lane.b32.xlu0 %v1382_v29, %s1450_s3 }
 0x803   :  { %v480_v30 = vpop.permute.xlu0 %479 }
 0x804   :  { %v482_v31 = vmul.f32 %v480_v30, %v465_v22 }
 0x806   :  { %484 = vrot.lane.b32.xlu1 %v482_v31, %s1451_s17 }
 0x878   :  { %v485_v32 = vpop.permute.xlu1 %484 }
 0x879   :  { %1234 = vmatmul.mubr.msk.f32.vlgmr.msra.gmra.mrb[4].mxu1 %vm47_vm0, %v485_v32  ;;  %v169_v32 = vadd.f32 %v1546_v16, %v1605_v7 }
 0x87a   :  { %1331 = vmatpush3.bf16.msra.mxu1 %v1507_v8  ;;  %1255 = vmatprep.mubr.msk.f32.mxu1 %vm1448_vm1, %v1449_v13 }
 0x87b   :  { %1332 = vmatprep.subr.bf16.mxu1 %v1447_v4 }
 0x87e   :  { %1334 = vmatpush3.bf16.msra.mxu1 %v1522_v14 }
 0x87f   :  { %1341 = vmatprep.subr.bf16.mxu1 %v1447_v4 }
 0x94c   :  { %v554_v34 = vpop.f32.mrb[4].mxu1 }
 0x94d   :  { %v558_v35 = vadd.f32 %v554_v34, %v154_v33  ;;  %v1235_v36 = vpop.f32.mrb[5].mxu1 }
 0x94f   :  { %v1104_v37 = vmul.f32 -1.442695, %v558_v35 }
 0x951   :  { %1383 = vpow2.f32 %v1104_v37 }
 0x952   :  { %1385 = vtanh.f32 %v558_v35 }
 0x95b   :  { %v1384_v38 = vpop.eup %1383 }
 0x95c   :  { %v563_v39 = vadd.f32 1.0, %v1384_v38  ;;  %v1386_v40 = vpop.eup %1385 }
 0x95e   :  { %1387 = vrcp.f32 %v563_v39 }
 0x968   :  { %v1388_v41 = vpop.eup %1387 }
 0x969   :  { %v566_v42 = vsel %vm1549_vm4, %v1386_v40, %v1388_v41 }
 0x96a   :  { %569 = vrot.lane.b32.xlu0 %v566_v42, %s1450_s3  ;;  %v567_v45 = vmul.f32 %v566_v42, %v476_v27 }
 0x9dc   :  { %v570_v43 = vpop.permute.xlu0 %569 }
 0x9dd   :  { %v572_v44 = vmul.f32 %v570_v43, %v566_v42 }
 0x9df   :  { %574 = vrot.lane.b32.xlu1 %v572_v44, %s1451_s17 }
 0xa51   :  { %v575_v46 = vpop.permute.xlu1 %574 }
 0xa52   :  { %v577_v47 = vadd.f32 %v575_v46, %v567_v45 }
 0xa54   :  { %1389 = vtanh.f32 %v577_v47 }
 0xa5e   :  { %v1390_v48 = vpop.eup %1389 }
 0xa5f   :  { %580 = vrot.lane.b32.xlu0 %v1390_v48, %s1450_s3 }
 0xad1   :  { %v581_v49 = vpop.permute.xlu0 %580 }
 0xad2   :  { %v583_v50 = vmul.f32 %v581_v49, %v566_v42  ;;  %v174_v49 = vadd.f32 %v1603_v6, %v1546_v16 }
 0xad4   :  { %585 = vrot.lane.b32.xlu1 %v583_v50, %s1451_s17 }
 0xb46   :  { %v586_v51 = vpop.permute.xlu1 %585 }
 0xb47   :  { %1245 = vmatmul.mubr.msk.f32.vlgmr.msra.gmra.mrb[10].mxu0 %vm47_vm0, %v586_v51 }
 0xb48   :  { %1337 = vmatpush3.bf16.msra.mxu0 %v1507_v8  ;;  %1266 = vmatprep.mubr.msk.f32.mxu0 %vm1448_vm1, %v1449_v13 }
 0xb49   :  { %1338 = vmatprep.subr.bf16.mxu0 %v1447_v4 }
 0xb4c   :  { %1340 = vmatpush3.bf16.msra.mxu0 %v1522_v14 }
 0xb4d   :  { %1347 = vmatprep.subr.bf16.mxu0 %v1447_v4 }
 0xc1a   :  { %v655_v53 = vpop.f32.mrb[10].mxu0 }
 0xc1b   :  { %v659_v54 = vadd.f32 %v655_v53, %v159_v52  ;;  %v1246_v55 = vpop.f32.mrb[11].mxu0 }
 0xc1d   :  { %v1106_v56 = vmul.f32 -1.442695, %v659_v54 }
 0xc1f   :  { %1391 = vpow2.f32 %v1106_v56 }
 0xc20   :  { %1393 = vtanh.f32 %v659_v54 }
 0xc29   :  { %v1392_v57 = vpop.eup %1391 }
 0xc2a   :  { %v664_v58 = vadd.f32 1.0, %v1392_v57  ;;  %v1394_v59 = vpop.eup %1393 }
 0xc2c   :  { %1395 = vrcp.f32 %v664_v58 }
 0xc36   :  { %v1396_v60 = vpop.eup %1395 }
 0xc37   :  { %v667_v61 = vsel %vm1549_vm4, %v1394_v59, %v1396_v60 }
 0xc38   :  { %670 = vrot.lane.b32.xlu0 %v667_v61, %s1450_s3  ;;  %v668_v0 = vmul.f32 %v667_v61, %v577_v47 }
 0xcaa   :  { %v671_v62 = vpop.permute.xlu0 %670 }
 0xcab   :  { %v673_v63 = vmul.f32 %v671_v62, %v667_v61  ;;  %v988_v62 = vld [vmem:[%s1717_s4] sm:$0xff] }
 0xcad   :  { %675 = vrot.lane.b32.xlu1 %v673_v63, %s1451_s17  ;;  %v989_v63 = vld [vmem:[%s1717_s4 + $0x8] sm:$0xff] }
 0xd1f   :  { %v676_v1 = vpop.permute.xlu1 %675 }
 0xd20   :  { %v678_v2 = vadd.f32 %v676_v1, %v668_v0  ;;  %v1348_v0 = vpack.c.bf16 %v989_v63, %v988_v62  ;;  %v991_v1 = vld [vmem:[%s1717_s4 + $0x18] sm:$0xff]  ;;  %s1452_s4 = smov [#allocation2]  }
 0xd21   :  { %s1081_s1 = sshll.u32 %s1452_s4, 4  ;;  %s1082_s1 = int_to_ptr.vmem [resolvable:$true] %s1081_s1 }
 0xd22   :  { %1397 = vtanh.f32 %v678_v2  ;;  %s1423_s2 = scalar_lea.vmem %s1082_s1, 128  ;;  %p1428_p1 = scmp.lt.s32.totalorder %s1082_s1, %s1082_s1 }
 0xd23   :  { %p1424_p0 = scmp.ne.s32.totalorder %s1082_s1, %s1423_s2  ;;  %p1429_p2 = scmp.lt.s32.totalorder %s1423_s2, %s1423_s2 }
 0xd25   :  { %p1430_p3 = por %p1429_p2, %p1428_p1 }
 0xd27   :  { %p1431_p4 = pnand %p1430_p3, %p1424_p0 }
 0xd2c   :  { %v1398_v5 = vpop.eup %1397 }
 0xd2d   :  { %681 = vrot.lane.b32.xlu0 %v1398_v5, %s1450_s3 }
 0xd9f   :  { %v682_v9 = vpop.permute.xlu0 %681 }
 0xda0   :  { %v684_v10 = vmul.f32 %v682_v9, %v667_v61 }
 0xda2   :  { %686 = vrot.lane.b32.xlu1 %v684_v10, %s1451_s17 }
 0xe14   :  { %v687_v11 = vpop.permute.xlu1 %686 }
 0xe15   :  { %1256 = vmatmul.mubr.msk.f32.vlgmr.msra.gmra.mrb[6].mxu1 %vm47_vm0, %v687_v11 }
 0xe16   :  { %1343 = vmatpush3.bf16.msra.mxu1 %v1507_v8  ;;  %1277 = vmatprep.mubr.msk.f32.mxu1 %vm1448_vm1, %v1449_v13 }
 0xe17   :  { %1344 = vmatprep.subr.bf16.mxu1 %v1447_v4 }
 0xe1a   :  { %1346 = vmatpush3.bf16.msra.mxu1 %v1522_v14 }
 0xee8   :  { %v756_v15 = vpop.f32.mrb[6].mxu1 }
 0xee9   :  { %v760_v17 = vadd.f32 %v756_v15, %v164_v12  ;;  %v1257_v18 = vpop.f32.mrb[7].mxu1  ;;  %v1113_v12 = vld [vmem:[%s1718_s5] ss:$0 sm:$0xff] }
 0xeeb   :  { %v1108_v19 = vmul.f32 -1.442695, %v760_v17 }
 0xeed   :  { %1399 = vpow2.f32 %v1108_v19 }
 0xeee   :  { %1401 = vtanh.f32 %v760_v17 }
 0xef7   :  { %v1400_v20 = vpop.eup %1399 }
 0xef8   :  { %v765_v21 = vadd.f32 1.0, %v1400_v20  ;;  %v1402_v8 = vpop.eup %1401 }
 0xefa   :  { %1403 = vrcp.f32 %v765_v21 }
 0xf04   :  { %v1404_v22 = vpop.eup %1403 }
 0xf05   :  { %v768_v23 = vsel %vm1549_vm4, %v1402_v8, %v1404_v22 }
 0xf06   :  { %771 = vrot.lane.b32.xlu0 %v768_v23, %s1450_s3  ;;  %v769_v3 = vmul.f32 %v768_v23, %v678_v2  ;;  %v1351_v2 = vpack.c.bf16 %v991_v1, %v990_v28 }
 0xf78   :  { %v772_v14 = vpop.permute.xlu0 %771 }
 0xf79   :  { %v774_v24 = vmul.f32 %v772_v14, %v768_v23 }
 0xf7b   :  { %776 = vrot.lane.b32.xlu1 %v774_v24, %s1451_s17 }
 0xfed   :  { %v777_v25 = vpop.permute.xlu1 %776 }
 0xfee   :  { %v779_v26 = vadd.f32 %v777_v25, %v769_v3 }
 0xff0   :  { %1405 = vtanh.f32 %v779_v26 }
 0xffa   :  { %v1406_v27 = vpop.eup %1405 }
 0xffb   :  { %782 = vrot.lane.b32.xlu0 %v1406_v27, %s1450_s3 }
0x106d   :  { %v783_v29 = vpop.permute.xlu0 %782 }
0x106e   :  { %v785_v30 = vmul.f32 %v783_v29, %v768_v23 }
0x1070   :  { %787 = vrot.lane.b32.xlu1 %v785_v30, %s1451_s17 }
0x10e2   :  { %v788_v31 = vpop.permute.xlu1 %787 }
0x10e3   :  { %1267 = vmatmul.mubr.msk.f32.vlgmr.msra.gmra.mrb[12].mxu0 %vm47_vm0, %v788_v31 }
0x10e4   :  { %1288 = vmatprep.mubr.msk.f32.mxu0 %vm1448_vm1, %v1449_v13  ;;  %1349 = vmatpush3.bf16.msra.mxu0 %v1348_v0 }
0x10e5   :  { %1350 = vmatprep.subr.bf16.mxu0 %v1447_v4 }
0x10e8   :  { %1352 = vmatpush3.bf16.msra.mxu0 %v1351_v2 }
0x11b6   :  { %v857_v33 = vpop.f32.mrb[12].mxu0 }
0x11b7   :  { %v861_v34 = vadd.f32 %v857_v33, %v169_v32  ;;  %v1268_v35 = vpop.f32.mrb[13].mxu0 }
0x11b9   :  { %v1110_v36 = vmul.f32 -1.442695, %v861_v34 }
0x11bb   :  { %1407 = vpow2.f32 %v1110_v36 }
0x11bc   :  { %1409 = vtanh.f32 %v861_v34 }
0x11c5   :  { %v1408_v37 = vpop.eup %1407 }
0x11c6   :  { %v866_v38 = vadd.f32 1.0, %v1408_v37  ;;  %v1410_v39 = vpop.eup %1409 }
0x11c8   :  { %1411 = vrcp.f32 %v866_v38 }
0x11d2   :  { %v1412_v40 = vpop.eup %1411 }
0x11d3   :  { %v869_v41 = vsel %vm1549_vm4, %v1410_v39, %v1412_v40 }
0x11d4   :  { %872 = vrot.lane.b32.xlu0 %v869_v41, %s1450_s3  ;;  %v870_v7 = vmul.f32 %v869_v41, %v779_v26 }
0x1246   :  { %v873_v13 = vpop.permute.xlu0 %872 }
0x1247   :  { %v875_v42 = vmul.f32 %v873_v13, %v869_v41 }
0x1249   :  { %877 = vrot.lane.b32.xlu1 %v875_v42, %s1451_s17 }
0x12bb   :  { %v878_v43 = vpop.permute.xlu1 %877 }
0x12bc   :  { %v880_v44 = vadd.f32 %v878_v43, %v870_v7 }
0x12be   :  { %1413 = vtanh.f32 %v880_v44 }
0x12c8   :  { %v1414_v45 = vpop.eup %1413 }
0x12c9   :  { %883 = vrot.lane.b32.xlu0 %v1414_v45, %s1450_s3 }
0x133b   :  { %v884_v46 = vpop.permute.xlu0 %883 }
0x133c   :  { %v886_v47 = vmul.f32 %v884_v46, %v869_v41 }
0x133e   :  { %888 = vrot.lane.b32.xlu1 %v886_v47, %s1451_s17 }
0x13b0   :  { %v889_v48 = vpop.permute.xlu1 %888 }
0x13b1   :  { %1278 = vmatmul.mubr.msk.f32.vlgmr.msra.gmra.mrb[8].mxu1 %vm47_vm0, %v889_v48 }
0x1484   :  { %v958_v50 = vpop.f32.mrb[8].mxu1 }
0x1485   :  { %v962_v51 = vadd.f32 %v958_v50, %v174_v49  ;;  %v1279_v52 = vpop.f32.mrb[9].mxu1 }
0x1487   :  { %v1112_v53 = vmul.f32 -1.442695, %v962_v51 }
0x1489   :  { %1415 = vpow2.f32 %v1112_v53 }
0x148a   :  { %1417 = vtanh.f32 %v962_v51 }
0x1493   :  { %v1416_v54 = vpop.eup %1415 }
0x1494   :  { %v967_v55 = vadd.f32 1.0, %v1416_v54  ;;  %v1418_v56 = vpop.eup %1417 }
0x1496   :  { %1419 = vrcp.f32 %v967_v55 }
0x14a0   :  { %v1420_v57 = vpop.eup %1419 }
0x14a1   :  { %v970_v58 = vsel %vm1549_vm4, %v1418_v56, %v1420_v57 }
0x14a2   :  { %973 = vrot.lane.b32.xlu0 %v970_v58, %s1450_s3  ;;  %v971_v16 = vmul.f32 %v970_v58, %v880_v44 }
0x1514   :  { %v974_v59 = vpop.permute.xlu0 %973 }
0x1515   :  { %v976_v60 = vmul.f32 %v974_v59, %v970_v58 }
0x1517   :  { %978 = vrot.lane.b32.xlu1 %v976_v60, %s1451_s17 }
0x1589   :  { %v979_v6 = vpop.permute.xlu1 %978 }
0x158a   :  { %v981_v61 = vadd.f32 %v979_v6, %v971_v16 }
0x158c   :  { %1421 = vtanh.f32 %v981_v61 }
0x1596   :  { %v1422_v5 = vpop.eup %1421 }
0x1597   :  { %984 = vrot.lane.b32.xlu0 %v1422_v5, %s1450_s3 }
0x1609   :  { %v985_v9 = vpop.permute.xlu0 %984 }
0x160a   :  { %v987_v10 = vmul.f32 %v985_v9, %v970_v58 }
0x160c   :  { %1000 = vrot.lane.b32.xlu1 %v987_v10, %s1451_s17 }
0x167e   :  { %v1001_v11 = vpop.permute.xlu1 %1000 }
0x167f   :  { %1289 = vmatmul.mubr.msk.f32.vlgmr.msra.gmra.mrb[14].mxu0 %vm47_vm0, %v1001_v11 }
0x1752   :  { %v1070_v15 = vpop.f32.mrb[14].mxu0 }
0x1753   :  { %v1071_v17 = vadd.f32 %v1113_v12, %v1070_v15  ;;  %v1290_v4 = vpop.f32.mrb[15].mxu0 }
0x1755   :  { %1074 = vst [vmem:[#allocation2] sm:$0xff] %v1071_v17 }
0x1756   :  { %1434 = shalt.err (!%p1431_p4)
}
0x1757   :  { %s1435_s3 = scalar_lea.hbm %s1719_s6, 128 }
0x1758   :  { %p1436_p5 = scmp.ne.s32.totalorder %s1719_s6, %s1435_s3  ;;  %p1439_p6 = scmp.lt.u32.totalorder %s1435_s3, %s1719_s6 }
0x175a   :  { %p1441_p7 = pnand %p1439_p6, %p1436_p5 }
0x175c   :  { %1444 = shalt.err (!%p1441_p7)
}
0x175d   :  { %1084 = dma.vmem_to_hbm [thread:$0]  %s1082_s1, 128, %s1719_s6, [#allocation3]  }
0x175e   :  { %1445 = dma.done.wait [#allocation3], 128  }
0x175f   :  { %1446 = vsyncadd [#allocation3], 4294967168 }
0x1760   :  { %1088 = vsyncpa [#allocation3], 1 }

</bundles_post_ra>
